<compile_context>
chip_gen: v6e
topology: v6e:2x2x1
jax: 0.10.0
libtpu: 0.0.40
codegen_flags: <defaults>
</compile_context>

<pallas_src>
import functools

import jax
import jax.numpy as jnp
from jax.experimental import pallas as pl
from jax.experimental.pallas import tpu as pltpu


def _proxy_group_loss_kernel(gp_ref, out_ref, *, threshold, cost, group_size):
    """gp_ref: (G, BR, 128) cooperation probabilities (row 0 = self).
    out_ref: (1, BR, 128) per-agent partials.

    Writes per-agent  (cost * p_self - tail)  so the wrapper's plain sum equals
    the module's  -acum_loss.
    """
    g = group_size
    t = threshold  # >= 1 (guarded in the wrapper)

    # --- truncated Poisson-binomial DP: keep only states 0 .. t-1 -----------
    # dp[j] == P(#cooperators among processed members == j); None == identically 0.
    p0 = gp_ref[0]                        # (BR, 128) self prob, full vregs
    dp = [None] * t
    dp[0] = 1.0 - p0
    if t > 1:
        dp[1] = p0

    for k in range(1, g):
        pk = gp_ref[k]                    # (BR, 128)
        qk = 1.0 - pk
        hi = min(k + 1, t - 1)            # triangular support: dp[j]==0 for j>k
        new_dp = [None] * t
        for j in range(hi + 1):
            cur = dp[j]
            below = dp[j - 1] if j >= 1 else None
            if cur is None and below is None:
                continue
            if cur is None:
                new_dp[j] = below * pk
            elif below is None:
                new_dp[j] = cur * qk
            else:
                new_dp[j] = cur * qk + below * pk
        dp = new_dp

    below_thr = dp[0]
    for j in range(1, t):
        if dp[j] is not None:
            below_thr = below_thr + dp[j]
    tail = 1.0 - below_thr                # P(#cooperators >= threshold)

    # per-agent contribution to -acum_loss (lane-dense store, no reduce here)
    out_ref[0] = cost * p0 - tail


def proxy_group_loss(gains, group_idx, *, threshold, cost, block_rows=32):
    """gains: (N,) last_expected_gain per agent.
    group_idx: (G, N) int32 — row 0 = self index, rows 1..G-1 = neighbor indices.
    Returns the scalar loss (float32)."""
    if threshold < 1:
        # padded agents have prob 0; for threshold == 0 each would add tail == 1.
        raise ValueError("threshold must be >= 1 for zero-prob padding to be inert")

    # sigmoid ONCE per agent, then gather probabilities into the (G, N) layout.
    p_all = jax.nn.sigmoid(gains.astype(jnp.float32))
    group_probs = p_all[group_idx].astype(jnp.float32)            # (G, N)
    g, n = group_probs.shape

    lanes = 128
    n_rows = pl.cdiv(n, lanes)
    # BR: sublane rows per block — multiple of 8 (full vregs), capped at block_rows.
    br = min(block_rows, max(8, ((n_rows + 7) // 8) * 8))
    rows_pad = pl.cdiv(n_rows, br) * br
    n_pad = rows_pad * lanes
    if n_pad != n:
        # padded agents: all probs 0 -> tail = 0 and cost term 0 (needs threshold>=1).
        group_probs = jnp.pad(group_probs, ((0, 0), (0, n_pad - n)))
    gp = group_probs.reshape(g, rows_pad, lanes)
    n_tiles = rows_pad // br

    kernel = functools.partial(
        _proxy_group_loss_kernel,
        threshold=threshold, cost=cost, group_size=g,
    )
    partials = pl.pallas_call(
        kernel,
        out_shape=jax.ShapeDtypeStruct((n_tiles, br, lanes), jnp.float32),
        grid_spec=pltpu.PrefetchScalarGridSpec(
            num_scalar_prefetch=0,
            grid=(n_tiles,),
            in_specs=[pl.BlockSpec((g, br, lanes), lambda i: (0, i, 0))],
            out_specs=pl.BlockSpec((1, br, lanes), lambda i: (i, 0, 0)),
        ),
        compiler_params=pltpu.CompilerParams(
            dimension_semantics=("parallel",),  # independent per-tile outputs
        ),
    )(gp)
    # loss = -sum_i (tail_i - cost * p_self_i); kernel already emitted the negation.
    return jnp.sum(partials)


def reference_loss(gains, group_idx, *, threshold, cost):
    """Pure-JAX reference (full untruncated Poisson-binomial DP)."""
    p = jax.nn.sigmoid(gains.astype(jnp.float32))[group_idx]      # (G, N)
    g, n = p.shape
    dp = jnp.zeros((g + 1, n), jnp.float32).at[0].set(1.0)
    for k in range(g):
        pk = p[k]
        shifted = jnp.concatenate([jnp.zeros((1, n)), dp[:-1]], axis=0)
        dp = dp * (1.0 - pk) + shifted * pk
    tail = dp[threshold:].sum(axis=0)
    return -(tail - cost * p[0]).sum()


if __name__ == "__main__":
    # Synthetic population: N agents on a ring, each with K=4 neighbors.
    N = 256          # number of agents
    K = 4            # neighbors per agent -> group_size G = K + 1 = 5
    G = K + 1
    THRESHOLD = (G + 1) // 2   # crd.get_threshold(group_size) = 3
    COST = 0.25                # crd.c

    key = jax.random.PRNGKey(0)
    # agent.last_expected_gain for every agent (deterministic).
    gains = jax.random.normal(key, (N,), dtype=jnp.float32)

    # Group membership: row 0 = self, rows 1..K = ring neighbors at offsets -2,-1,+1,+2.
    offsets = jnp.array([-2, -1, 1, 2], dtype=jnp.int32)
    idx = jnp.arange(N, dtype=jnp.int32)
    nbr_idx = (idx[None, :] + offsets[:, None]) % N               # (K, N)
    group_idx = jnp.concatenate([idx[None, :], nbr_idx], axis=0)  # (G, N)

    loss = proxy_group_loss(gains, group_idx, threshold=THRESHOLD, cost=COST)
    loss = jax.block_until_ready(loss)

    ref = reference_loss(gains, group_idx, threshold=THRESHOLD, cost=COST)
    if not jnp.allclose(loss, ref, rtol=1e-5, atol=1e-5):
        raise AssertionError(f"mismatch: pallas={loss} ref={ref}")

    print("KERNEL_OK")
</pallas_src>

<mosaic_0001>
module attributes {stable_mosaic.version = 11 : i64} {
  func.func @_proxy_group_loss_kernel(%arg0: i32, %arg1: memref<5x8x128xf32, #tpu.memory_space<vmem>>, %arg2: memref<1x8x128xf32, #tpu.memory_space<vmem>>) attributes {dimension_semantics = [#tpu.dimension_semantics<parallel>], iteration_bounds = array<i64: 1>, scalar_prefetch = 0 : i64, scratch_operands = 0 : i64, tpu.core_type = #tpu.core_type<tc>, window_params = [{transform_indices = @transform_0, window_bounds = array<i64: 5, 8, 128>}, {transform_indices = @transform_1, window_bounds = array<i64: 1, 8, 128>}]} {
    %c0 = arith.constant 0 : index
    %c0_0 = arith.constant 0 : index
    %c0_1 = arith.constant 0 : index
    %0 = vector.load %arg1[%c0, %c0_0, %c0_1] : memref<5x8x128xf32, #tpu.memory_space<vmem>>, vector<1x8x128xf32>
    %1 = vector.shape_cast %0 : vector<1x8x128xf32> to vector<8x128xf32>
    %cst = arith.constant 1.000000e+00 : f32
    %2 = vector.broadcast %cst : f32 to vector<8x128xf32>
    %3 = arith.subf %2, %1 : vector<8x128xf32>
    %c1 = arith.constant 1 : index
    %c0_2 = arith.constant 0 : index
    %c0_3 = arith.constant 0 : index
    %4 = vector.load %arg1[%c1, %c0_2, %c0_3] : memref<5x8x128xf32, #tpu.memory_space<vmem>>, vector<1x8x128xf32>
    %5 = vector.shape_cast %4 : vector<1x8x128xf32> to vector<8x128xf32>
    %cst_4 = arith.constant 1.000000e+00 : f32
    %6 = vector.broadcast %cst_4 : f32 to vector<8x128xf32>
    %7 = arith.subf %6, %5 : vector<8x128xf32>
    %8 = arith.mulf %3, %7 : vector<8x128xf32>
    %9 = arith.mulf %1, %7 : vector<8x128xf32>
    %10 = arith.mulf %3, %5 : vector<8x128xf32>
    %11 = arith.addf %9, %10 : vector<8x128xf32>
    %12 = arith.mulf %1, %5 : vector<8x128xf32>
    %c2 = arith.constant 2 : index
    %c0_5 = arith.constant 0 : index
    %c0_6 = arith.constant 0 : index
    %13 = vector.load %arg1[%c2, %c0_5, %c0_6] : memref<5x8x128xf32, #tpu.memory_space<vmem>>, vector<1x8x128xf32>
    %14 = vector.shape_cast %13 : vector<1x8x128xf32> to vector<8x128xf32>
    %cst_7 = arith.constant 1.000000e+00 : f32
    %15 = vector.broadcast %cst_7 : f32 to vector<8x128xf32>
    %16 = arith.subf %15, %14 : vector<8x128xf32>
    %17 = arith.mulf %8, %16 : vector<8x128xf32>
    %18 = arith.mulf %11, %16 : vector<8x128xf32>
    %19 = arith.mulf %8, %14 : vector<8x128xf32>
    %20 = arith.addf %18, %19 : vector<8x128xf32>
    %21 = arith.mulf %12, %16 : vector<8x128xf32>
    %22 = arith.mulf %11, %14 : vector<8x128xf32>
    %23 = arith.addf %21, %22 : vector<8x128xf32>
    %c3 = arith.constant 3 : index
    %c0_8 = arith.constant 0 : index
    %c0_9 = arith.constant 0 : index
    %24 = vector.load %arg1[%c3, %c0_8, %c0_9] : memref<5x8x128xf32, #tpu.memory_space<vmem>>, vector<1x8x128xf32>
    %25 = vector.shape_cast %24 : vector<1x8x128xf32> to vector<8x128xf32>
    %cst_10 = arith.constant 1.000000e+00 : f32
    %26 = vector.broadcast %cst_10 : f32 to vector<8x128xf32>
    %27 = arith.subf %26, %25 : vector<8x128xf32>
    %28 = arith.mulf %17, %27 : vector<8x128xf32>
    %29 = arith.mulf %20, %27 : vector<8x128xf32>
    %30 = arith.mulf %17, %25 : vector<8x128xf32>
    %31 = arith.addf %29, %30 : vector<8x128xf32>
    %32 = arith.mulf %23, %27 : vector<8x128xf32>
    %33 = arith.mulf %20, %25 : vector<8x128xf32>
    %34 = arith.addf %32, %33 : vector<8x128xf32>
    %c4 = arith.constant 4 : index
    %c0_11 = arith.constant 0 : index
    %c0_12 = arith.constant 0 : index
    %35 = vector.load %arg1[%c4, %c0_11, %c0_12] : memref<5x8x128xf32, #tpu.memory_space<vmem>>, vector<1x8x128xf32>
    %36 = vector.shape_cast %35 : vector<1x8x128xf32> to vector<8x128xf32>
    %cst_13 = arith.constant 1.000000e+00 : f32
    %37 = vector.broadcast %cst_13 : f32 to vector<8x128xf32>
    %38 = arith.subf %37, %36 : vector<8x128xf32>
    %39 = arith.mulf %28, %38 : vector<8x128xf32>
    %40 = arith.mulf %31, %38 : vector<8x128xf32>
    %41 = arith.mulf %28, %36 : vector<8x128xf32>
    %42 = arith.addf %40, %41 : vector<8x128xf32>
    %43 = arith.mulf %34, %38 : vector<8x128xf32>
    %44 = arith.mulf %31, %36 : vector<8x128xf32>
    %45 = arith.addf %43, %44 : vector<8x128xf32>
    %46 = arith.addf %39, %42 : vector<8x128xf32>
    %47 = arith.addf %46, %45 : vector<8x128xf32>
    %cst_14 = arith.constant 1.000000e+00 : f32
    %48 = vector.broadcast %cst_14 : f32 to vector<8x128xf32>
    %49 = arith.subf %48, %47 : vector<8x128xf32>
    %cst_15 = arith.constant 2.500000e-01 : f32
    %50 = vector.broadcast %cst_15 : f32 to vector<8x128xf32>
    %51 = arith.mulf %50, %1 : vector<8x128xf32>
    %52 = arith.subf %51, %49 : vector<8x128xf32>
    %c0_16 = arith.constant 0 : index
    %c0_17 = arith.constant 0 : index
    %c0_18 = arith.constant 0 : index
    %53 = vector.load %arg2[%c0_16, %c0_17, %c0_18] : memref<1x8x128xf32, #tpu.memory_space<vmem>>, vector<1x8x128xf32>
    %54 = vector.shape_cast %53 : vector<1x8x128xf32> to vector<8x128xf32>
    %55 = vector.shape_cast %52 : vector<8x128xf32> to vector<1x8x128xf32>
    tpu.vector_store %arg2[%c0_16, %c0_17, %c0_18], %55 {strides = array<i32>} : memref<1x8x128xf32, #tpu.memory_space<vmem>>, vector<1x8x128xf32>,
    return
  }
  func.func @transform_0(%arg0: i32) -> (i32, i32, i32) {
    %c0_i32 = arith.constant 0 : i32
    %c0_i32_0 = arith.constant 0 : i32
    %c0_i32_1 = arith.constant 0 : i32
    return %c0_i32, %arg0, %c0_i32_0 : i32, i32, i32
  }
  func.func @transform_1(%arg0: i32) -> (i32, i32, i32) {
    %c0_i32 = arith.constant 0 : i32
    %c0_i32_0 = arith.constant 0 : i32
    %c0_i32_1 = arith.constant 0 : i32
    return %arg0, %c0_i32, %c0_i32_0 : i32, i32, i32
  }
}

</mosaic_0001>

<bundles_post_ra>
// kernel: tpu_custom_call.1
= control target key start
LH: loop header
LB: loop body
LE: loop exit
PB: predicated region body
PF: predicated region fallthrough
CT: control target
= control target key end

     0   :  { %6 = vsyncpa [#allocation3], 0  ;;  %s152_s0 = inlined_call_operand.hbm [shape: f32[5,8,128], index: 0, kind: input, shape index: {}]   ;;  %s153_s1 = inlined_call_operand.hbm [shape: f32[1,8,128], index: 1, kind: output, shape index: {}]  }
   0x1   :  { %7 = vsyncpa [#allocation4], 0  ;;  %s132_s6 = smov [#allocation2]  }
   0x2   :  { %s13_s7 = sshll.u32 %s132_s6, 4  ;;  %s14_s7 = int_to_ptr.vmem [resolvable:$true] %s13_s7 }
   0x3   :  { %s96_s8 = scalar_lea.vmem %s14_s7, 640  ;;  %p101_p1 = scmp.lt.s32.totalorder %s14_s7, %s14_s7 }
   0x4   :  { %p97_p0 = scmp.ne.s32.totalorder %s14_s7, %s96_s8  ;;  %p102_p2 = scmp.lt.s32.totalorder %s96_s8, %s96_s8 }
   0x6   :  { %p103_p3 = por %p102_p2, %p101_p1 }
   0x8   :  { %p104_p4 = pnand %p103_p3, %p97_p0 }
   0xa   :  { %107 = shalt.err (!%p104_p4)
}
   0xb   :  { %s133_s9 = smov 128   ;;  %s134_s10 = smov 8  }
   0xc   :  { %19 = dma.hbm_to_vmem [thread:$0]  %s152_s0, 640, %s14_s7, [#allocation3], %s133_s9, %s133_s9, %s134_s10  }
   0xd   :  { %128 = dma.done.wait [#allocation3], 640  }
   0xe   :  { %129 = vsyncadd [#allocation3], 4294966656  ;;  %v23_v0 = vld [vmem:[#allocation2] sm:$0xff]  ;;  %v26_v1 = vld [vmem:[#allocation2 + $0x8] sm:$0xff]  ;;  %s135_s0 = smov [#allocation5]  }
   0xf   :  { %v34_v2 = vld [vmem:[#allocation2 + $0x10] sm:$0xff]  ;;  %v24_v3 = vsub.f32 1.0, %v23_v0  ;;  %v27_v4 = vsub.f32 1.0, %v26_v1  ;;  %v32_v5 = vmul.f32 %v26_v1, %v23_v0  ;;  %v44_v10 = vld [vmem:[#allocation2 + $0x18] sm:$0xff]  ;;  %v54_v18 = vld [vmem:[#allocation2 + $0x20] sm:$0xff]  ;;  %v66_v38 = vmul.f32 0.25, %v23_v0 }
  0x10   :  { %v35_v9 = vsub.f32 1.0, %v34_v2  ;;  %v45_v17 = vsub.f32 1.0, %v44_v10  ;;  %v55_v26 = vsub.f32 1.0, %v54_v18  ;;  %s75_s13 = sshll.u32 %s135_s0, 4  ;;  %s76_s13 = int_to_ptr.vmem [resolvable:$true] %s75_s13 }
  0x11   :  { %v28_v6 = vmul.f32 %v27_v4, %v24_v3  ;;  %v29_v7 = vmul.f32 %v27_v4, %v23_v0  ;;  %v30_v8 = vmul.f32 %v26_v1, %v24_v3  ;;  %s108_s14 = scalar_lea.vmem %s76_s13, 128  ;;  %p113_p6 = scmp.lt.s32.totalorder %s76_s13, %s76_s13 }
  0x12   :  { %v40_v14 = vmul.f32 %v35_v9, %v32_v5  ;;  %p109_p5 = scmp.ne.s32.totalorder %s76_s13, %s108_s14  ;;  %p114_p7 = scmp.lt.s32.totalorder %s108_s14, %s108_s14 }
  0x13   :  { %v31_v11 = vadd.f32 %v30_v8, %v29_v7  ;;  %v36_v12 = vmul.f32 %v35_v9, %v28_v6  ;;  %v38_v13 = vmul.f32 %v34_v2, %v28_v6 }
  0x14   :  { %p115_p8 = por %p114_p7, %p113_p6 }
  0x15   :  { %v37_v15 = vmul.f32 %v35_v9, %v31_v11  ;;  %v41_v16 = vmul.f32 %v34_v2, %v31_v11  ;;  %v46_v21 = vmul.f32 %v45_v17, %v36_v12  ;;  %v48_v22 = vmul.f32 %v44_v10, %v36_v12 }
  0x16   :  { %p116_p9 = pnand %p115_p8, %p109_p5 }
  0x17   :  { %v39_v19 = vadd.f32 %v38_v13, %v37_v15  ;;  %v42_v20 = vadd.f32 %v41_v16, %v40_v14  ;;  %v58_v29 = vmul.f32 %v54_v18, %v46_v21  ;;  %v56_v30 = vmul.f32 %v55_v26, %v46_v21 }
  0x19   :  { %v47_v23 = vmul.f32 %v45_v17, %v39_v19  ;;  %v50_v24 = vmul.f32 %v45_v17, %v42_v20  ;;  %v51_v25 = vmul.f32 %v44_v10, %v39_v19 }
  0x1b   :  { %v49_v27 = vadd.f32 %v48_v22, %v47_v23  ;;  %v52_v28 = vadd.f32 %v51_v25, %v50_v24 }
  0x1d   :  { %v57_v31 = vmul.f32 %v55_v26, %v49_v27  ;;  %v60_v32 = vmul.f32 %v55_v26, %v52_v28  ;;  %v61_v33 = vmul.f32 %v54_v18, %v49_v27 }
  0x1f   :  { %v59_v34 = vadd.f32 %v58_v29, %v57_v31  ;;  %v62_v35 = vadd.f32 %v61_v33, %v60_v32 }
  0x21   :  { %v63_v36 = vadd.f32 %v59_v34, %v56_v30 }
  0x23   :  { %v64_v37 = vadd.f32 %v63_v36, %v62_v35 }
  0x25   :  { %v65_v39 = vsub.f32 1.0, %v64_v37 }
  0x27   :  { %v67_v40 = vsub.f32 %v66_v38, %v65_v39 }
  0x29   :  { %68 = vst [vmem:[#allocation5] sm:$0xff] %v67_v40 }
  0x2a   :  { %119 = shalt.err (!%p116_p9)
}
  0x2b   :  { %78 = dma.vmem_to_hbm [thread:$0]  %s76_s13, 128, %s153_s1, [#allocation4]  }
  0x2c   :  { %130 = dma.done.wait [#allocation4], 128  }
  0x2d   :  { %131 = vsyncadd [#allocation4], 4294967168 }
  0x2e   :  { %82 = vsyncpa [#allocation3], 1 }
  0x2f   :  { %83 = vsyncpa [#allocation4], 1 }

</bundles_post_ra>
